<compile_context>
chip_gen: v5e
topology: v5e:2x2
jax: 0.10.0
libtpu: 0.0.40
codegen_flags: <defaults>
</compile_context>

<pallas_src>
import jax
import jax.numpy as jnp
from jax.experimental import pallas as pl
from jax.experimental.pallas import tpu as pltpu


def _round_up(x, m):
    return (x + m - 1) // m * m


def gmf_kernel(u_idx_ref, i_idx_ref,     # (1, TB) int32 index tiles (VMEM)
               u_tab_hbm, i_tab_hbm,     # (D, rows_pad) bf16 tables in HBM (pl.ANY)
               b_ref,                    # (1, 1) f32 bias in SMEM
               o_ref,                    # (1, TB) f32 output tile (lane-dense)
               u_tab_vmem, i_tab_vmem,   # single-buffered VMEM table scratch
               dma_sems):                # DMA semaphores (2,)
    # One-time HBM -> VMEM copy of both tables (single-buffered residency).
    @pl.when(pl.program_id(0) == 0)
    def _():
        u_cp = pltpu.make_async_copy(u_tab_hbm, u_tab_vmem, dma_sems.at[0])
        i_cp = pltpu.make_async_copy(i_tab_hbm, i_tab_vmem, dma_sems.at[1])
        u_cp.start()
        i_cp.start()
        u_cp.wait()
        i_cp.wait()

    u_idx = u_idx_ref[...]               # (1, TB)
    i_idx = i_idx_ref[...]               # (1, TB)
    tb = u_idx.shape[1]
    nu = u_tab_vmem.shape[1]
    ni = i_tab_vmem.shape[1]

    # One-hot selection matrices (rows, TB); padded rows / padded batch lanes
    # never match an index (padded lanes simply produce sigmoid(bias) and are
    # sliced off in the wrapper).
    u_sel = jax.lax.broadcasted_iota(jnp.int32, (nu, tb), 0) == u_idx
    i_sel = jax.lax.broadcasted_iota(jnp.int32, (ni, tb), 0) == i_idx
    u_oh = jnp.where(u_sel, 1.0, 0.0).astype(jnp.bfloat16)   # exact 0/1 in bf16
    i_oh = jnp.where(i_sel, 1.0, 0.0).astype(jnp.bfloat16)

    # MXU gather of TB embedding columns per table:
    # (D, rows) x (rows, TB) -> (D, TB), f32 accumulation.
    u_emb = jnp.dot(u_tab_vmem[...], u_oh, preferred_element_type=jnp.float32)
    i_emb = jnp.dot(i_tab_vmem[...], i_oh, preferred_element_type=jnp.float32)

    # Affine weight w is pre-folded into the user table, so the logit is just
    # an elementwise product + sublane (XLU) reduction; bias from SMEM,
    # sigmoid on the EUP.
    logit = jnp.sum(u_emb * i_emb, axis=0, keepdims=True) + b_ref[0, 0]  # (1, TB)
    o_ref[...] = jax.nn.sigmoid(logit).astype(o_ref.dtype)


def gmf_prepare_params(user_table, item_table, w, *, table_dtype=jnp.bfloat16):
    """One-time parameter prep.  Hoist out of the per-call path (cache it):
       - fold the torch-Linear weight w (1, D) into the user table (f32),
       - pad rows to a multiple of 128 (full-lane contraction dim),
       - transpose to (D, rows_pad),
       - cast to bf16 (MXU-native); f32 accumulation stays in the kernel."""
    D = user_table.shape[1]
    w_row = jnp.asarray(w, jnp.float32).reshape(1, D)

    def prep(tab, scale=None):
        tab = jnp.asarray(tab, jnp.float32)
        if scale is not None:
            tab = tab * scale                       # fold w once, in f32
        rows = tab.shape[0]
        rows_pad = _round_up(rows, 128)
        tab = jnp.pad(tab, ((0, rows_pad - rows), (0, 0)))
        return tab.T.astype(table_dtype)            # (D, rows_pad)

    return prep(user_table, w_row), prep(item_table)


def gmf_forward(user_indices, item_indices, u_tab_t, i_tab_t, b, *, tile_b=128):
    """user_indices, item_indices: (B,) int
       u_tab_t, i_tab_t: prepared (D, rows_pad) tables from gmf_prepare_params
       b: (1,) bias.  Returns (B, 1) float32 ratings.
       tile_b: 128 everywhere; 256 is worth trying on v6e/v7x for large B."""
    B = int(user_indices.shape[0])

    num_tiles = -(-B // tile_b)
    b_pad = num_tiles * tile_b
    u_idx = jnp.pad(user_indices.astype(jnp.int32), (0, b_pad - B)).reshape(1, b_pad)
    i_idx = jnp.pad(item_indices.astype(jnp.int32), (0, b_pad - B)).reshape(1, b_pad)
    b_smem = jnp.asarray(b, jnp.float32).reshape(1, 1)

    # Explicit VMEM budget: single-buffered tables + generous headroom, kept
    # safely under v7x's 64 MiB physical VMEM (v5e/v6e have 128 MiB).
    table_bytes = (u_tab_t.size * u_tab_t.dtype.itemsize
                   + i_tab_t.size * i_tab_t.dtype.itemsize)
    vmem_limit = int(min(table_bytes + (8 << 20), 48 << 20))

    out = pl.pallas_call(
        gmf_kernel,
        grid=(num_tiles,),
        in_specs=[
            pl.BlockSpec((1, tile_b), lambda t: (0, t)),        # user idx tile
            pl.BlockSpec((1, tile_b), lambda t: (0, t)),        # item idx tile
            pl.BlockSpec(memory_space=pl.ANY),                  # user table (HBM)
            pl.BlockSpec(memory_space=pl.ANY),                  # item table (HBM)
            pl.BlockSpec(memory_space=pltpu.MemorySpace.SMEM),  # bias scalar
        ],
        out_specs=pl.BlockSpec((1, tile_b), lambda t: (0, t)),  # lane-dense output
        out_shape=jax.ShapeDtypeStruct((1, b_pad), jnp.float32),
        scratch_shapes=[
            pltpu.VMEM(u_tab_t.shape, u_tab_t.dtype),           # single-buffered
            pltpu.VMEM(i_tab_t.shape, i_tab_t.dtype),           # single-buffered
            pltpu.SemaphoreType.DMA((2,)),
        ],
        compiler_params=pltpu.CompilerParams(
            dimension_semantics=("arbitrary",),   # one-time table copy at step 0
            vmem_limit_bytes=vmem_limit,
        ),
    )(u_idx, i_idx, u_tab_t, i_tab_t, b_smem)

    return out[0, :B].reshape(B, 1)


if __name__ == "__main__":
    # Small config consistent with the module; batch not a multiple of the
    # tile size to exercise padding + a 2-step grid.
    num_users, num_items, latent_dim, batch = 50, 75, 32, 200

    key = jax.random.PRNGKey(0)
    k_u, k_i, k_w, k_b, k_ui, k_ii = jax.random.split(key, 6)

    # weight_init_gaussian: N(0, 0.01) for embeddings and linear weight.
    user_table = 0.01 * jax.random.normal(k_u, (num_users, latent_dim), jnp.float32)
    item_table = 0.01 * jax.random.normal(k_i, (num_items, latent_dim), jnp.float32)
    w = 0.01 * jax.random.normal(k_w, (1, latent_dim), jnp.float32)   # torch Linear layout
    bound = 1.0 / (latent_dim ** 0.5)
    b = jax.random.uniform(k_b, (1,), jnp.float32, -bound, bound)

    user_indices = jax.random.randint(k_ui, (batch,), 0, num_users, jnp.int32)
    item_indices = jax.random.randint(k_ii, (batch,), 0, num_items, jnp.int32)

    # One-time table prep (hoisted out of the per-call path).
    u_tab_t, i_tab_t = gmf_prepare_params(user_table, item_table, w)

    rating = gmf_forward(user_indices, item_indices, u_tab_t, i_tab_t, b)
    rating = jax.block_until_ready(rating)

    # Pure-JAX f32 reference for correctness (tables are bf16 in the kernel,
    # so use a loosened tolerance).
    ref = jax.nn.sigmoid(
        (user_table[user_indices] * item_table[item_indices]) @ w.T + b[None, :])
    assert rating.shape == (batch, 1)
    assert jnp.allclose(rating, ref, atol=2e-3), "mismatch vs reference"

    print("KERNEL_OK")
</pallas_src>

<mosaic_0001>
module attributes {stable_mosaic.version = 11 : i64} {
  func.func @gmf_kernel(%arg0: i32, %arg1: memref<1x128xi32, #tpu.memory_space<vmem>>, %arg2: memref<1x128xi32, #tpu.memory_space<vmem>>, %arg3: memref<32x128xbf16, #tpu.memory_space<any>>, %arg4: memref<32x128xbf16, #tpu.memory_space<any>>, %arg5: memref<1x1xf32, #tpu.memory_space<smem>>, %arg6: memref<1x128xf32, #tpu.memory_space<vmem>>, %arg7: memref<32x128xbf16, #tpu.memory_space<vmem>>, %arg8: memref<32x128xbf16, #tpu.memory_space<vmem>>, %arg9: memref<2x!tpu.dma_semaphore, #tpu.memory_space<semaphore_mem>>) attributes {dimension_semantics = [#tpu.dimension_semantics<arbitrary>], iteration_bounds = array<i64: 2>, scalar_prefetch = 0 : i64, scratch_operands = 3 : i64, tpu.core_type = #tpu.core_type<tc>, window_params = [{transform_indices = @transform_0, window_bounds = array<i64: 1, 128>}, {transform_indices = @transform_1, window_bounds = array<i64: 1, 128>}, {}, {}, {transform_indices = @transform_4, window_bounds = array<i64: 1, 1>}, {transform_indices = @transform_5, window_bounds = array<i64: 1, 128>}]} {
    %c0_i32 = arith.constant 0 : i32
    %0 = arith.cmpi eq, %arg0, %c0_i32 : i32
    %1 = arith.extui %0 : i1 to i32
    %c0_i32_0 = arith.constant 0 : i32
    %2 = arith.cmpi ne, %1, %c0_i32_0 : i32
    scf.if %2 {
      %c0_i32_19 = arith.constant 0 : i32
      %35 = tpu.memref_slice %arg9[%c0_i32_19] : memref<2x!tpu.dma_semaphore, #tpu.memory_space<semaphore_mem>> -> memref<1x!tpu.dma_semaphore, #tpu.memory_space<semaphore_mem>>
      %36 = tpu.memref_squeeze %35 : memref<1x!tpu.dma_semaphore, #tpu.memory_space<semaphore_mem>> -> memref<!tpu.dma_semaphore, #tpu.memory_space<semaphore_mem>>
      tpu.enqueue_dma source(%arg3 : memref<32x128xbf16, #tpu.memory_space<any>>) target(%arg7 : memref<32x128xbf16, #tpu.memory_space<vmem>>) target_semaphore(%36 : memref<!tpu.dma_semaphore, #tpu.memory_space<semaphore_mem>>)
      %c1_i32 = arith.constant 1 : i32
      %37 = tpu.memref_slice %arg9[%c1_i32] : memref<2x!tpu.dma_semaphore, #tpu.memory_space<semaphore_mem>> -> memref<1x!tpu.dma_semaphore, #tpu.memory_space<semaphore_mem>>
      %38 = tpu.memref_squeeze %37 : memref<1x!tpu.dma_semaphore, #tpu.memory_space<semaphore_mem>> -> memref<!tpu.dma_semaphore, #tpu.memory_space<semaphore_mem>>
      tpu.enqueue_dma source(%arg4 : memref<32x128xbf16, #tpu.memory_space<any>>) target(%arg8 : memref<32x128xbf16, #tpu.memory_space<vmem>>) target_semaphore(%38 : memref<!tpu.dma_semaphore, #tpu.memory_space<semaphore_mem>>)
      %c0_i32_20 = arith.constant 0 : i32
      %39 = tpu.memref_slice %arg9[%c0_i32_20] : memref<2x!tpu.dma_semaphore, #tpu.memory_space<semaphore_mem>> -> memref<1x!tpu.dma_semaphore, #tpu.memory_space<semaphore_mem>>
      %40 = tpu.memref_squeeze %39 : memref<1x!tpu.dma_semaphore, #tpu.memory_space<semaphore_mem>> -> memref<!tpu.dma_semaphore, #tpu.memory_space<semaphore_mem>>
      tpu.wait_dma2 semaphore(%40 : memref<!tpu.dma_semaphore, #tpu.memory_space<semaphore_mem>>) src(%arg3 : memref<32x128xbf16, #tpu.memory_space<any>>) dst(%arg7 : memref<32x128xbf16, #tpu.memory_space<vmem>>)
      %c1_i32_21 = arith.constant 1 : i32
      %41 = tpu.memref_slice %arg9[%c1_i32_21] : memref<2x!tpu.dma_semaphore, #tpu.memory_space<semaphore_mem>> -> memref<1x!tpu.dma_semaphore, #tpu.memory_space<semaphore_mem>>
      %42 = tpu.memref_squeeze %41 : memref<1x!tpu.dma_semaphore, #tpu.memory_space<semaphore_mem>> -> memref<!tpu.dma_semaphore, #tpu.memory_space<semaphore_mem>>
      tpu.wait_dma2 semaphore(%42 : memref<!tpu.dma_semaphore, #tpu.memory_space<semaphore_mem>>) src(%arg4 : memref<32x128xbf16, #tpu.memory_space<any>>) dst(%arg8 : memref<32x128xbf16, #tpu.memory_space<vmem>>)
    } else {
    }
    %c0 = arith.constant 0 : index
    %c0_1 = arith.constant 0 : index
    %3 = vector.load %arg1[%c0, %c0_1] : memref<1x128xi32, #tpu.memory_space<vmem>>, vector<1x128xi32>
    %c0_2 = arith.constant 0 : index
    %c0_3 = arith.constant 0 : index
    %4 = vector.load %arg2[%c0_2, %c0_3] : memref<1x128xi32, #tpu.memory_space<vmem>>, vector<1x128xi32>
    %5 = tpu.iota {dimensions = array<i32: 0>} : vector<128x128xi32>
    %6 = vector.broadcast %3 : vector<1x128xi32> to vector<128x128xi32>
    %7 = arith.cmpi eq, %5, %6 : vector<128x128xi32>
    %8 = tpu.iota {dimensions = array<i32: 0>} : vector<128x128xi32>
    %9 = vector.broadcast %4 : vector<1x128xi32> to vector<128x128xi32>
    %10 = arith.cmpi eq, %8, %9 : vector<128x128xi32>
    %cst = arith.constant 1.000000e+00 : f32
    %cst_4 = arith.constant 0.000000e+00 : f32
    %11 = vector.broadcast %cst : f32 to vector<128x128xf32>
    %12 = vector.broadcast %cst_4 : f32 to vector<128x128xf32>
    %13 = arith.select %7, %11, %12 : vector<128x128xi1>, vector<128x128xf32>
    %14 = arith.truncf %13 : vector<128x128xf32> to vector<128x128xbf16>
    %cst_5 = arith.constant 1.000000e+00 : f32
    %cst_6 = arith.constant 0.000000e+00 : f32
    %15 = vector.broadcast %cst_5 : f32 to vector<128x128xf32>
    %16 = vector.broadcast %cst_6 : f32 to vector<128x128xf32>
    %17 = arith.select %10, %15, %16 : vector<128x128xi1>, vector<128x128xf32>
    %18 = arith.truncf %17 : vector<128x128xf32> to vector<128x128xbf16>
    %c0_7 = arith.constant 0 : index
    %c0_8 = arith.constant 0 : index
    %19 = vector.load %arg7[%c0_7, %c0_8] : memref<32x128xbf16, #tpu.memory_space<vmem>>, vector<32x128xbf16>
    %cst_9 = arith.constant dense<0.000000e+00> : vector<32x128xf32>
    %20 = tpu.matmul %19, %14, %cst_9 {dimension_numbers = #tpu.dot_dimension_numbers<[1], [0], [0], [1], [0, 0, 1, 1], [], []>} : vector<32x128xbf16>, vector<128x128xbf16>, vector<32x128xf32> -> vector<32x128xf32>
    %c0_10 = arith.constant 0 : index
    %c0_11 = arith.constant 0 : index
    %21 = vector.load %arg8[%c0_10, %c0_11] : memref<32x128xbf16, #tpu.memory_space<vmem>>, vector<32x128xbf16>
    %cst_12 = arith.constant dense<0.000000e+00> : vector<32x128xf32>
    %22 = tpu.matmul %21, %18, %cst_12 {dimension_numbers = #tpu.dot_dimension_numbers<[1], [0], [0], [1], [0, 0, 1, 1], [], []>} : vector<32x128xbf16>, vector<128x128xbf16>, vector<32x128xf32> -> vector<32x128xf32>
    %23 = arith.mulf %20, %22 : vector<32x128xf32>
    %cst_13 = arith.constant dense<0.000000e+00> : vector<128xf32>
    %24 = vector.multi_reduction <add>, %23, %cst_13 [0] : vector<32x128xf32> to vector<128xf32>
    %25 = vector.shape_cast %24 : vector<128xf32> to vector<1x128xf32>
    %c0_14 = arith.constant 0 : index
    %c0_15 = arith.constant 0 : index
    %26 = memref.load %arg5[%c0_14, %c0_15] : memref<1x1xf32, #tpu.memory_space<smem>>
    %27 = vector.broadcast %26 : f32 to vector<1x128xf32>
    %28 = arith.addf %25, %27 : vector<1x128xf32>
    %29 = arith.negf %28 : vector<1x128xf32>
    %30 = math.exp %29 : vector<1x128xf32>
    %cst_16 = arith.constant 1.000000e+00 : f32
    %31 = vector.broadcast %cst_16 : f32 to vector<1x128xf32>
    %32 = arith.addf %31, %30 : vector<1x128xf32>
    %33 = arith.divf %31, %32 : vector<1x128xf32>
    %c0_17 = arith.constant 0 : index
    %c0_18 = arith.constant 0 : index
    %34 = vector.load %arg6[%c0_17, %c0_18] : memref<1x128xf32, #tpu.memory_space<vmem>>, vector<1x128xf32>
    tpu.vector_store %arg6[%c0_17, %c0_18], %33 {strides = array<i32>} : memref<1x128xf32, #tpu.memory_space<vmem>>, vector<1x128xf32>,
    return
  }
  func.func @transform_0(%arg0: i32) -> (i32, i32) {
    %c0_i32 = arith.constant 0 : i32
    %c0_i32_0 = arith.constant 0 : i32
    return %c0_i32, %arg0 : i32, i32
  }
  func.func @transform_1(%arg0: i32) -> (i32, i32) {
    %c0_i32 = arith.constant 0 : i32
    %c0_i32_0 = arith.constant 0 : i32
    return %c0_i32, %arg0 : i32, i32
  }
  func.func @transform_4(%arg0: i32) -> (i32, i32) {
    %c0_i32 = arith.constant 0 : i32
    %c0_i32_0 = arith.constant 0 : i32
    %c0_i32_1 = arith.constant 0 : i32
    return %c0_i32, %c0_i32_0 : i32, i32
  }
  func.func @transform_5(%arg0: i32) -> (i32, i32) {
    %c0_i32 = arith.constant 0 : i32
    %c0_i32_0 = arith.constant 0 : i32
    return %c0_i32, %arg0 : i32, i32
  }
}

</mosaic_0001>

<bundles_post_ra>
// kernel: tpu_custom_call.1
= control target key start
LH: loop header
LB: loop body
LE: loop exit
PB: predicated region body
PF: predicated region fallthrough
CT: control target
= control target key end

     0   :  { %s1124_s0 = inlined_call_operand.vmem [shape: s32[1,256], index: 0, kind: input, shape index: {}]   ;;  %s1125_s1 = inlined_call_operand.hbm [shape: s32[1,256], index: 1, kind: input, shape index: {}]   ;;  %s1126_s2 = inlined_call_operand.hbm [shape: bf16[32,128], index: 2, kind: input, shape index: {}]   ;;  %s1127_s3 = inlined_call_operand.hbm [shape: bf16[32,128], index: 3, kind: input, shape index: {}]   ;;  %s1128_s4 = inlined_call_operand.<no memory space> [shape: f32[1,1], index: 4, kind: input, shape index: {}]   ;;  %s1129_s5 = inlined_call_operand.hbm [shape: f32[1,256], index: 5, kind: output, shape index: {}]  }
   0x1   :  { %10 = sst [smem:[#allocation5]] %s1128_s4 }
   0x2   :  { %11 = vsyncpa [#allocation7], 0 }
   0x3   :  { %13 = vsyncpa [#allocation7 + $0x1], 0 }
   0x4   :  { %14 = vsyncpa [#allocation8], 0 }
   0x5   :  { %16 = vsyncpa [#allocation8 + $0x1], 0  ;;  %s878_s20 = smov 0   ;;  %s880_s21 = smov 0  }
   0x6   :  { %s882_s22 = smov 0   ;;  %s884_s23 = smov 0  }
   0x7 LB: > { %s899_s4 = sadd.s32 4294967295, %s840_s23   ;;  %s541_s24 = sadd.s32 4294967294, %s840_s23   ;;  %s840_s23 = sphi %s884_s23, %s1146_s23   ;;  %s836_s22 = sphi %s882_s22, %s1145_s22   ;;  %s832_s21 = sphi %s880_s21, %s1144_s21   ;;  %s828_s20 = sphi %s878_s20, %s1143_s20  }
   0x8   : > { %s903_s25 = sadd.s32 1, %s840_s23   ;;  %s55_s26 = sadd.s32 1, %s836_s22 }
   0x9   : > { %s52_s27 = ssub.s32 %s840_s23, %s903_s25  ;;  %p62_p0 = scmp.ne.s32.totalorder %s836_s22, %s832_s21 }
   0xa   : > { %p53_p1 = scmp.eq.s32.totalorder %s52_s27, 0  ;;  %p63_p2 = scmp.eq.s32.totalorder %s840_s23, 0 }
   0xb   : > { %p68_p3 = scmp.ne.s32.totalorder %s832_s21, %s828_s20  ;;  %p1130_p4 = scmp.eq.s32.totalorder %s899_s4, 0 }
   0xc   : > { %s915_s28 = scalar_select %p53_p1, %s836_s22, %s55_s26  }
   0xd   : > { %p917_p5 = por %p63_p2, %p62_p0  ;;  %p923_p6 = por %p1130_p4, %p68_p3 }
   0xe   : > { %p113_p7 = scmp.eq.s32.totalorder %s899_s4, 1  ;;  %p119_p8 = scmp.eq.s32.totalorder %s541_s24, 1 }
   0xf   : > { %p636_p10 = scmp.lt.s32.totalorder %s840_s23, 2  ;;  %s148_s8 = sand.u32 1, %s836_s22  }
  0x10   : > { %p930_p11 = por %p113_p7, %p62_p0  ;;  %p934_p12 = por %p119_p8, %p68_p3 }
  0x11   : > { %s154_s11 = scalar_lea.hbm %s1125_s1, %s840_s23  ;;  %s151_s13 = scalar_lea.vmem [#allocation6], %s148_s8 }
  0x12   : > { %s156_s12 = sshll.u32 %s154_s11, 4  ;;  %s158_s14 = sshll.u32 %s151_s13, 4  ;;  %s157_s12 = int_to_ptr.hbm [resolvable:$true] %s156_s12  ;;  %s159_s14 = int_to_ptr.vmem [resolvable:$true] %s158_s14 }
  0x13   : > { %p945_p13 = pnand %p636_p10, %p917_p5  ;;  %p544_p0 = scmp.ge.s32.totalorder %s840_s23, 1 }
  0x14   : > { %p163_p1 = scmp.lt.s32.totalorder %s840_s23, 3  ;;  %s149_s16 = scalar_lea.sflag [#allocation7], %s148_s8 }
  0x15   : > { %s680_s17 = sshra.s32 %s157_s12, 4  ;;  %p684_p3 = pneg %p945_p13  ;;  %s681_s17 = int_to_ptr.hbm [resolvable:$true] %s680_s17 }
  0x16   : > { %s682_s18 = scalar_lea.hbm %s681_s17, 1  ;;  %s687_s26 = scalar_lea.hbm %s1125_s1, 2 }
  0x17   : > { %p683_p2 = scmp.ne.s32.totalorder %s681_s17, %s682_s18  ;;  %p688_p5 = scmp.lt.s32.totalorder %s681_s17, %s1125_s1 }
  0x18   : > { %p689_p10 = scmp.lt.s32.totalorder %s687_s26, %s682_s18 }
  0x19   : > { %p685_p7 = pnand %p684_p3, %p683_p2 }
  0x1a   : > { %p690_p9 = por %p689_p10, %p688_p5 }
  0x1b   : > { %p686_p8 = pneg %p685_p7 }
  0x1d   : > { %p691_p4 = pnand %p690_p9, %p686_p8 }
  0x1f   : > { %694 = shalt.err (!%p691_p4)
}
  0x20   : > { %631 = dma.hbm_to_vmem [thread:$0]  (!%p945_p13), %s157_s12, 16, %s159_s14, %s149_s16  }
  0x21   : > { %p164_p2 = pnand %p544_p0, %p163_p1 }
  0x22   : > { %s966_s8 = sand.u32 (!%p164_p2), 1, %s832_s21  }
  0x23   : > { %167 = sbr.rel (%p164_p2) target bundleno = 284 (0x11c), region = 32  ;;  %s170_s9 = scalar_lea.sflag (!%p164_p2), [#allocation7], %s966_s8 }
  0x24   : > { %s172_s10 = scalar_lea.vmem (!%p164_p2), [#allocation6], %s966_s8 }
  0x28   : > { %811 = dma.done.wait (%p923_p6), %s170_s9, 16  }
  0x29   : > { %813 = vsyncadd (%p923_p6), %s170_s9, 4294967280  ;;  %p197_p4 = scmp.lt.s32.totalorder %s899_s4, 1  ;;  %s211_s13 = sshll.u32 %s1126_s2, 4  ;;  %s212_s13 = int_to_ptr.hbm [resolvable:$true] %s211_s13 }
  0x2a   : > { %s842_s18 = smov [#allocation2]   ;;  %s225_s26 = sshll.u32 %s1127_s3, 4  ;;  %s226_s26 = int_to_ptr.hbm [resolvable:$true] %s225_s26 }
  0x2b   : > { %s198_s14 = scalar_select %p197_p4, %s899_s4, 1 }
  0x2c   : > { %s213_s30 = sshll.u32 %s842_s18, 4  ;;  %p1136_p6 = scmp.eq.s32.totalorder %s899_s4, 0  ;;  %s214_s30 = int_to_ptr.vmem [resolvable:$true] %s213_s30 }
  0x2d   : > { %s199_s17 = scalar_lea.vmem %s1124_s0, %s198_s14  ;;  %s843_s27 = smov [#allocation3]  }
  0x2e   : > { %622 = dma.hbm_to_vmem [thread:$0]  (%p1136_p6), %s212_s13, 256, %s214_s30, [#allocation4] }
  0x2f   : > { %s227_s29 = sshll.u32 %s843_s27, 4  ;;  %p1137_p9 = pmov %p1136_p6  ;;  %s228_s29 = int_to_ptr.vmem [resolvable:$true] %s227_s29 }
  0x30   : > { %s196_s9 = scalar_lea.vmem [#allocation9], %s966_s8  ;;  %p1138_p13 = pmov %p1136_p6 }
  0x31   : > { %623 = dma.hbm_to_vmem [thread:$0]  (%p1137_p9), %s226_s26, 256, %s228_s29, [#allocation4 + $0x1] }
  0x32   : > { %815 = dma.done.wait (%p1138_p13), [#allocation4], 256  ;;  %p1139_p0 = pmov %p1136_p6 }
  0x34   : > { %817 = vsyncadd (%p1139_p0), [#allocation4], 4294967040  ;;  %p1140_p1 = pmov %p1139_p0 }
  0x35   : > { %p1141_p3 = pmov %p1139_p0 }
  0x36   : > { %819 = dma.done.wait (%p1140_p1), [#allocation4 + $0x1], 256 }
  0x37   : > { %821 = vsyncadd (%p1141_p3), [#allocation4 + $0x1], 4294967040  ;;  %v239_v0 = vlaneseq  ;;  %v1004_v6 = vld [vmem:[%s199_s17] ss:$0 sm:$0xff]  ;;  %v844_v10 = vmov 1.0|1.0   ;;  %s453_s13 = scalar_lea.hbm %s1129_s5, %s899_s4 }
  0x38   : > { %v1008_v7 = vld [vmem:[%s172_s10] ss:$0 sm:$0xff]  ;;  %v600_v21 = vld [vmem:[#allocation2 + $0x8] sm:$0xff]  ;;  %v601_v22 = vld [vmem:[#allocation3] sm:$0xff]  ;;  %s421_s10 = sld [smem:[#allocation5]]  ;;  %s455_s14 = sshll.u32 %s196_s9, 4  ;;  %s456_s14 = int_to_ptr.vmem [resolvable:$true] %s455_s14 }
  0x39   : > { %v998_v1 = vshrl.u32 %v239_v0, 7  ;;  %v599_v20 = vld [vmem:[#allocation2] sm:$0xff]  ;;  %v602_v23 = vld [vmem:[#allocation3 + $0x8] sm:$0xff]  ;;  %s457_s15 = sshll.u32 %s453_s13, 4  ;;  %s445_s4 = scalar_lea.sflag [#allocation8], %s966_s8  ;;  %s458_s15 = int_to_ptr.hbm [resolvable:$true] %s457_s15 }
  0x3a   : > { %s780_s16 = sshra.s32 %s458_s15, 4  ;;  %s786_s19 = scalar_lea.hbm %s1129_s5, 2  ;;  %s781_s16 = int_to_ptr.hbm [resolvable:$true] %s780_s16 }
  0x3b   : > { %v254_v2 = vadd.s32 112, %v998_v1  ;;  %v255_v3 = vadd.s32 120, %v998_v1  ;;  %v252_v4 = vadd.s32 96, %v998_v1  ;;  %v253_v5 = vadd.s32 104, %v998_v1  ;;  %s782_s17 = scalar_lea.hbm %s781_s16, 1  ;;  %p787_p10 = scmp.lt.s32.totalorder %s781_s16, %s1129_s5 }
  0x3c   : > { %v250_v8 = vadd.s32 80, %v998_v1  ;;  %v251_v9 = vadd.s32 88, %v998_v1  ;;  %v248_v11 = vadd.s32 64, %v998_v1  ;;  %v249_v12 = vadd.s32 72, %v998_v1  ;;  %p783_p7 = scmp.ne.s32.totalorder %s781_s16, %s782_s17  ;;  %p788_p2 = scmp.lt.s32.totalorder %s786_s19, %s782_s17 }
  0x3d   : > { %vm271_vm0 = vcmp.eq.s32.totalorder %v254_v2, %v1004_v6  ;;  %vm272_vm1 = vcmp.eq.s32.totalorder %v255_v3, %v1004_v6  ;;  %vm269_vm2 = vcmp.eq.s32.totalorder %v252_v4, %v1004_v6  ;;  %vm270_vm3 = vcmp.eq.s32.totalorder %v253_v5, %v1004_v6 }
  0x3e   : > { %vm554_vm4 = vmpackc.low %vm272_vm1, %vm271_vm0  ;;  %vm288_vm5 = vcmp.eq.s32.totalorder %v254_v2, %v1008_v7  ;;  %vm289_vm6 = vcmp.eq.s32.totalorder %v255_v3, %v1008_v7  ;;  %vm286_vm7 = vcmp.eq.s32.totalorder %v252_v4, %v1008_v7  ;;  %vm287_vm8 = vcmp.eq.s32.totalorder %v253_v5, %v1008_v7  ;;  %p784_p8 = pnand %p783_p7, %p930_p11  ;;  %p789_p4 = por %p788_p2, %p787_p10 }
  0x3f   : > { %555 = vmatpush.bf16.msk.msra.mxu0 %vm554_vm4, %v844_v10  ;;  %603 = vmatpush.bf16.msk.msra.mxu2 %vm554_vm4, %v844_v10  ;;  %vm578_vm9 = vmpackc.low %vm289_vm6, %vm288_vm5  ;;  %vm267_vm12 = vcmp.eq.s32.totalorder %v250_v8, %v1004_v6  ;;  %vm268_vm13 = vcmp.eq.s32.totalorder %v251_v9, %v1004_v6  ;;  %vm284_vm14 = vcmp.eq.s32.totalorder %v250_v8, %v1008_v7  ;;  %v246_v13 = vadd.s32 48, %v998_v1 }
  0x40   : > { %579 = vmatpush.bf16.msk.msra.mxu1 %vm578_vm9, %v844_v10  ;;  %611 = vmatpush.bf16.msk.msra.mxu3 %vm578_vm9, %v844_v10  ;;  %vm556_vm10 = vmpackc.low %vm270_vm3, %vm269_vm2  ;;  %vm285_vm15 = vcmp.eq.s32.totalorder %v251_v9, %v1008_v7  ;;  %vm265_vm2 = vcmp.eq.s32.totalorder %v248_v11, %v1004_v6  ;;  %vm266_vm3 = vcmp.eq.s32.totalorder %v249_v12, %v1004_v6  ;;  %v247_v14 = vadd.s32 56, %v998_v1  ;;  %p785_p5 = pneg %p784_p8 }
  0x41   : > { %vm580_vm11 = vmpackc.low %vm287_vm8, %vm286_vm7  ;;  %vm282_vm4 = vcmp.eq.s32.totalorder %v248_v11, %v1008_v7  ;;  %vm283_vm5 = vcmp.eq.s32.totalorder %v249_v12, %v1008_v7  ;;  %vm263_vm8 = vcmp.eq.s32.totalorder %v246_v13, %v1004_v6  ;;  %v244_v15 = vadd.s32 32, %v998_v1 }
  0x42   : > { %vm558_vm0 = vmpackc.low %vm268_vm13, %vm267_vm12  ;;  %vm264_vm9 = vcmp.eq.s32.totalorder %v247_v14, %v1004_v6  ;;  %v245_v16 = vadd.s32 40, %v998_v1  ;;  %v242_v17 = vadd.s32 16, %v998_v1  ;;  %v243_v18 = vadd.s32 24, %v998_v1  ;;  %p790_p6 = pnand %p789_p4, %p785_p5 }
  0x43   : > { %557 = vmatpush.bf16.msk.msra.mxu0 %vm556_vm10, %v844_v10  ;;  %604 = vmatpush.bf16.msk.msra.mxu2 %vm556_vm10, %v844_v10  ;;  %vm582_vm1 = vmpackc.low %vm285_vm15, %vm284_vm14  ;;  %vm280_vm10 = vcmp.eq.s32.totalorder %v246_v13, %v1008_v7  ;;  %vm261_vm14 = vcmp.eq.s32.totalorder %v244_v15, %v1004_v6  ;;  %v241_v19 = vadd.s32 8, %v998_v1  ;;  %v422_v44 = vstv %s421_s10 }
  0x44   : > { %581 = vmatpush.bf16.msk.msra.mxu1 %vm580_vm11, %v844_v10  ;;  %612 = vmatpush.bf16.msk.msra.mxu3 %vm580_vm11, %v844_v10  ;;  %vm560_vm6 = vmpackc.low %vm266_vm3, %vm265_vm2  ;;  %vm281_vm11 = vcmp.eq.s32.totalorder %v247_v14, %v1008_v7  ;;  %vm262_vm15 = vcmp.eq.s32.totalorder %v245_v16, %v1004_v6 }
  0x45   : > { %vm584_vm7 = vmpackc.low %vm283_vm5, %vm282_vm4  ;;  %vm259_vm4 = vcmp.eq.s32.totalorder %v242_v17, %v1004_v6  ;;  %vm260_vm5 = vcmp.eq.s32.totalorder %v243_v18, %v1004_v6 }
  0x46   : > { %vm562_vm12 = vmpackc.low %vm264_vm9, %vm263_vm8 }
  0x47   : > { %559 = vmatpush.bf16.msk.msra.mxu0 %vm558_vm0, %v844_v10  ;;  %605 = vmatpush.bf16.msk.msra.mxu2 %vm558_vm0, %v844_v10  ;;  %vm586_vm13 = vmpackc.low %vm281_vm11, %vm280_vm10  ;;  %vm278_vm0 = vcmp.eq.s32.totalorder %v244_v15, %v1008_v7  ;;  %vm257_vm10 = vcmp.eq.s32.totalorder %v998_v1, %v1004_v6  ;;  %vm258_vm11 = vcmp.eq.s32.totalorder %v241_v19, %v1004_v6 }
  0x48   : > { %583 = vmatpush.bf16.msk.msra.mxu1 %vm582_vm1, %v844_v10  ;;  %613 = vmatpush.bf16.msk.msra.mxu3 %vm582_vm1, %v844_v10  ;;  %vm279_vm1 = vcmp.eq.s32.totalorder %v245_v16, %v1008_v7  ;;  %vm564_vm2 = vmpackc.low %vm262_vm15, %vm261_vm14 }
  0x49   : > { %vm588_vm3 = vmpackc.low %vm279_vm1, %vm278_vm0 }
  0x4a   : > { %vm566_vm8 = vmpackc.low %vm260_vm5, %vm259_vm4 }
  0x4b   : > { %561 = vmatpush.bf16.msk.msra.mxu0 %vm560_vm6, %v844_v10  ;;  %606 = vmatpush.bf16.msk.msra.mxu2 %vm560_vm6, %v844_v10  ;;  %vm276_vm6 = vcmp.eq.s32.totalorder %v242_v17, %v1008_v7  ;;  %vm568_vm14 = vmpackc.low %vm258_vm11, %vm257_vm10 }
  0x4c   : > { %585 = vmatpush.bf16.msk.msra.mxu1 %vm584_vm7, %v844_v10  ;;  %614 = vmatpush.bf16.msk.msra.mxu3 %vm584_vm7, %v844_v10  ;;  %vm277_vm7 = vcmp.eq.s32.totalorder %v243_v18, %v1008_v7 }
  0x4d   : > { %vm590_vm9 = vmpackc.low %vm277_vm7, %vm276_vm6 }
  0x4f   : > { %563 = vmatpush.bf16.msk.msra.mxu0 %vm562_vm12, %v844_v10  ;;  %607 = vmatpush.bf16.msk.msra.mxu2 %vm562_vm12, %v844_v10  ;;  %vm274_vm12 = vcmp.eq.s32.totalorder %v998_v1, %v1008_v7 }
  0x50   : > { %587 = vmatpush.bf16.msk.msra.mxu1 %vm586_vm13, %v844_v10  ;;  %615 = vmatpush.bf16.msk.msra.mxu3 %vm586_vm13, %v844_v10  ;;  %vm275_vm13 = vcmp.eq.s32.totalorder %v241_v19, %v1008_v7 }
  0x51   : > { %vm592_vm15 = vmpackc.low %vm275_vm13, %vm274_vm12 }
  0x53   : > { %565 = vmatpush.bf16.msk.msra.mxu0 %vm564_vm2, %v844_v10  ;;  %608 = vmatpush.bf16.msk.msra.mxu2 %vm564_vm2, %v844_v10 }
  0x54   : > { %589 = vmatpush.bf16.msk.msra.mxu1 %vm588_vm3, %v844_v10  ;;  %616 = vmatpush.bf16.msk.msra.mxu3 %vm588_vm3, %v844_v10 }
  0x57   : > { %567 = vmatpush.bf16.msk.msra.mxu0 %vm566_vm8, %v844_v10  ;;  %609 = vmatpush.bf16.msk.msra.mxu2 %vm566_vm8, %v844_v10 }
  0x58   : > { %591 = vmatpush.bf16.msk.msra.mxu1 %vm590_vm9, %v844_v10  ;;  %617 = vmatpush.bf16.msk.msra.mxu3 %vm590_vm9, %v844_v10 }
  0x5b   : > { %569 = vmatpush.bf16.msk.msra.mxu0 %vm568_vm14, %v844_v10  ;;  %610 = vmatpush.bf16.msk.msra.mxu2 %vm568_vm14, %v844_v10 }
  0x5c   : > { %593 = vmatpush.bf16.msk.msra.mxu1 %vm592_vm15, %v844_v10  ;;  %618 = vmatpush.bf16.msk.msra.mxu3 %vm592_vm15, %v844_v10 }
  0x5e   : > { %362 = vmatmul.bf16.vlgmr.msra.gmra.mxu0 %v599_v20  ;;  %367 = vmatmul.bf16.vlgmr.msra.gmra.mxu2 %v600_v21 }
  0x5f   : > { %397 = vmatmul.bf16.vlgmr.msra.gmra.mxu1 %v601_v22  ;;  %402 = vmatmul.bf16.vlgmr.msra.gmra.mxu3 %v602_v23 }
  0xdb   : > { %v363_v24 = vpop.f32.mrf.mxu0 }
  0xdc   : > { %v398_v25 = vpop.f32.mrf.mxu1 }
  0xdd   : > { %v408_v30 = vmul.f32 %v398_v25, %v363_v24 }
  0xe1   : > { %v368_v26 = vpop.f32.mrf.mxu2 }
  0xe2   : > { %v403_v27 = vpop.f32.mrf.mxu3 }
  0xe3   : > { %v365_v28 = vpop.f32.mrf.mxu0  ;;  %v410_v33 = vmul.f32 %v403_v27, %v368_v26 }
  0xe4   : > { %v400_v29 = vpop.f32.mrf.mxu1 }
  0xe5   : > { %v409_v31 = vmul.f32 %v400_v29, %v365_v28 }
  0xe7   : > { %v412_v32 = vadd.f32 %v409_v31, %v408_v30 }
  0xe9   : > { %v370_v34 = vpop.f32.mrf.mxu2  ;;  %v413_v37 = vadd.f32 %v412_v32, %v410_v33 }
  0xea   : > { %v405_v35 = vpop.f32.mrf.mxu3 }
  0xeb   : > { %v411_v36 = vmul.f32 %v405_v35, %v370_v34 }
  0xed   : > { %v414_v38 = vadd.f32 %v413_v37, %v411_v36 }
  0xef   : > { %v415_v39 = vrot.slane %v414_v38, 4 }
  0xf1   : > { %v416_v40 = vadd.f32 %v415_v39, %v414_v38 }
  0xf3   : > { %v417_v41 = vrot.slane %v416_v40, 2 }
  0xf5   : > { %v418_v42 = vadd.f32 %v417_v41, %v416_v40 }
  0xf7   : > { %v419_v43 = vrot.slane %v418_v42, 1 }
  0xf9   : > { %v420_v45 = vadd.f32 %v419_v43, %v418_v42 }
  0xfb   : > { %v423_v46 = vadd.f32 %v422_v44, %v420_v45 }
  0xfd   : > { %v594_v47 = vmul.f32 -1.442695, %v423_v46 }
  0xff   : > { %676 = vpow2.f32 %v594_v47 }
 0x105   : > { %v677_v48 = vpop.eup %676 }
 0x106   : > { %v427_v49 = vadd.f32 1.0, %v677_v48 }
 0x108   : > { %678 = vrcp.f32 %v427_v49  ;;  %v439_v53 = vand.u32 2147483648, %v427_v49  ;;  %v437_v55 = vand.u32 2147483647, %v427_v49  ;;  %vm433_vm1 = vweird.f32 %v427_v49 }
 0x10a   : > { %v440_v57 = vor.u32 1.1754944e-38, %v439_v53  ;;  %vm438_vm3 = vcmp.eq.f32.partialorder %v437_v55, 8.507059e+37 }
 0x10e   : > { %v679_v50 = vpop.eup %678 }
 0x10f   : > { %v429_v51 = vmul.f32 %v679_v50, %v427_v49  ;;  %vm434_vm0 = vweird.f32 %v679_v50 }
 0x110   : > { %vm435_vm2 = vmor %vm433_vm1, %vm434_vm0 }
 0x111   : > { %v430_v52 = vsub.f32 1.0, %v429_v51 }
 0x113   : > { %v431_v54 = vmul.f32 %v679_v50, %v430_v52 }
 0x115   : > { %v432_v56 = vadd.f32 %v679_v50, %v431_v54 }
 0x117   : > { %v436_v58 = vsel %vm435_vm2, %v679_v50, %v432_v56 }
 0x118   : > { %v441_v59 = vsel %vm438_vm3, %v440_v57, %v436_v58 }
 0x119   : > { %443 = vst [vmem:[%s196_s9] sm:$0x1] %v441_v59 }
 0x11a   : > { %793 = shalt.err (!%p790_p6)
}
 0x11b   : > { %626 = dma.vmem_to_hbm [thread:$0]  (%p930_p11), %s456_s14, 16, %s458_s15, %s445_s4  }
 0x11c PF: > { %s469_s8 = sand.u32 1, %s828_s20   ;;  %p1142_p9 = scmp.ge.s32.totalorder %s840_s23, 2 }
 0x11d   : > { %s470_s27 = scalar_lea.sflag [#allocation8], %s469_s8 }
 0x11e   : > { %p633_p13 = pnand %p1142_p9, %p934_p12 }
 0x120   : > { %p634_p0 = pneg %p633_p13 }
 0x122   : > { %823 = dma.done.wait (%p634_p0), %s470_s27, 16  }
 0x123   : > { %825 = vsyncadd (%p634_p0), %s470_s27, 4294967280  ;;  %p19_p1 = scmp.ge.s32.totalorder %s903_s25, 4   ;;  %s1143_s20 = smov %s832_s21 }
 0x124   : > { %s1144_s21 = smov %s836_s22  ;;  %s1145_s22 = smov %s915_s28 }
 0x125   : > { %s1146_s23 = smov %s903_s25  ;;  %21 = sbr.rel (!%p19_p1) target bundleno = 7 (0x7), region = 94 }
 0x12a   :  { %475 = vsyncpa [#allocation7], 1 }
 0x12b   :  { %477 = vsyncpa [#allocation7 + $0x1], 1 }
 0x12c   :  { %478 = vsyncpa [#allocation8], 1 }
 0x12d   :  { %480 = vsyncpa [#allocation8 + $0x1], 1 }
 0x12e   :  { %481 = vsyncmov [#allocation4] }
 0x131   :  { %s482_s23 = vpop.sfrf %481 }
 0x132   :  { %p597_p11 = scmp.ne.s32.totalorder %s482_s23, 0 }
 0x134   :  { %486 = shalt.err (%p597_p11)  }
 0x135   :  { %488 = vsyncmov [#allocation4 + $0x1] }
 0x138   :  { %s489_s6 = vpop.sfrf %488 }
 0x139   :  { %p598_p12 = scmp.ne.s32.totalorder %s489_s6, 0 }
 0x13b   :  { %493 = shalt.err (%p598_p12)  }

</bundles_post_ra>
